<compile_context>
chip_gen: v5e
topology: v5e:2x2
jax: 0.10.0
libtpu: 0.0.40
codegen_flags: <defaults>
</compile_context>

<pallas_src>
import functools

import jax
import jax.numpy as jnp
from jax.experimental import pallas as pl
from jax.experimental.pallas import tpu as pltpu


def _mlp_kernel(x_ref, w_in_ref, b_in_ref, w_h_ref, b_h_ref, w_out_ref,
                b_out_ref, o_ref, *, n_hidden_layers):
    cdt = w_in_ref.dtype  # MXU operand dtype (bf16 default, f32 optional)

    # Input layer: Linear(dim, H) + ReLU, f32 accumulation on the MXU.
    h = jnp.dot(x_ref[...].astype(cdt), w_in_ref[...],
                preferred_element_type=jnp.float32)
    h = jnp.maximum(h + b_in_ref[...].astype(jnp.float32), 0.0)

    # Hidden layers: Linear(H, H) + ReLU, static unroll.
    for l in range(n_hidden_layers):
        h = jnp.dot(h.astype(cdt), w_h_ref[l],
                    preferred_element_type=jnp.float32)
        h = jnp.maximum(h + b_h_ref[l].astype(jnp.float32), 0.0)

    # Output layer Linear(H, 1): contract over H against the (1, H) weight row
    # so logits come out lane-dense as (1, TB) (one M=1 MXU push; avoids both
    # an N=1 matmul and a (TB,1)->(1,TB) relayout before the store).
    w_out_row = w_out_ref[...].astype(jnp.float32)             # (1, H)
    logits = jnp.einsum("oh,bh->ob", w_out_row, h,
                        preferred_element_type=jnp.float32)    # (1, TB)
    logits = logits + b_out_ref[0]                             # SMEM scalar

    # Numerically safe sigmoid; the divide uses the EUP reciprocal slot.
    z = jnp.exp(-jnp.abs(logits))
    r = pl.reciprocal(1.0 + z, approx=True)
    sig = jnp.where(logits >= 0.0, r, z * r)

    o_ref[...] = sig.reshape(o_ref.shape).astype(o_ref.dtype)


def discriminator_forward(x, params, *, n_hidden_layers, block_b=None,
                          compute_dtype=jnp.bfloat16):
    """x: [B, dim] -> [B, 1] float32 probabilities.

    params = (w_in [dim,H], b_in [1,H], w_h [L,H,H], b_h [L,1,H],
              w_out [1,H], b_out [1,1]).
    Matmul weights (and x, in-kernel) are cast to `compute_dtype` (bf16 by
    default); accumulation and all elementwise math stay f32.
    """
    w_in, b_in, w_h, b_h, w_out, b_out = params
    B, dim = x.shape
    H = w_in.shape[1]
    L = n_hidden_layers
    assert w_h.shape == (L, H, H), (w_h.shape, (L, H, H))

    cdt = jnp.dtype(compute_dtype)
    # One-time weight casts (tiny). Biases are added after f32 accumulation so
    # they are kept in f32; b_out becomes an SMEM scalar.
    w_in = w_in.astype(cdt)
    w_h = w_h.astype(cdt)
    w_out = jnp.reshape(w_out, (1, H)).astype(cdt)
    b_in = jnp.reshape(b_in, (1, H)).astype(jnp.float32)
    b_h = jnp.reshape(b_h, (L, 1, H)).astype(jnp.float32)
    b_out = jnp.reshape(b_out, (1,)).astype(jnp.float32)

    # Batch tile: big enough to amortize per-step overhead and fill the MXU,
    # but keep >= 2 tiles so the grid can be split across TensorCores.
    if block_b is None:
        block_b = 128
        for cand in (1024, 512, 256):
            if B >= 2 * cand:
                block_b = cand
                break
    n_tiles = pl.cdiv(B, block_b)
    b_pad = n_tiles * block_b
    if b_pad != B:
        # TODO(synk): for large B prefer a pre-padded input; this pad is an
        # extra HBM round-trip of x (negligible at small B).
        x = jnp.pad(x, ((0, b_pad - B), (0, 0)))

    # VMEM budget from actual buffer math: resident weights single-buffered
    # (Buffered(1)), x/out tiles double-buffered, plus activation headroom.
    x_isz = x.dtype.itemsize
    w_bytes = ((w_in.size + w_h.size + w_out.size) * cdt.itemsize
               + (b_in.size + b_h.size) * 4)
    vmem_needed = (w_bytes
                   + 2 * block_b * dim * x_isz      # x tiles
                   + 2 * block_b * 4                # out tiles
                   + 4 * block_b * H * 4            # activation working set
                   + (4 << 20))                     # headroom
    vmem_limit = int(min(max(vmem_needed, 32 << 20), 64 << 20))

    cost = pl.CostEstimate(
        flops=2 * b_pad * (dim * H + L * H * H + H),
        transcendentals=2 * b_pad,
        bytes_accessed=int(b_pad * dim * x_isz + w_bytes + b_pad * 4),
    )

    kernel = functools.partial(_mlp_kernel, n_hidden_layers=L)
    resident = pl.Buffered(buffer_count=1)  # constant blocks: no double buffer

    out = pl.pallas_call(
        kernel,
        out_shape=jax.ShapeDtypeStruct((n_tiles, 1, block_b), jnp.float32),
        grid=(n_tiles,),
        in_specs=[
            pl.BlockSpec((block_b, dim), lambda i: (i, 0)),                 # x tile
            pl.BlockSpec((dim, H), lambda i: (0, 0),
                         pipeline_mode=resident),                          # w_in
            pl.BlockSpec((1, H), lambda i: (0, 0),
                         pipeline_mode=resident),                          # b_in
            pl.BlockSpec((L, H, H), lambda i: (0, 0, 0),
                         pipeline_mode=resident),                          # w_h
            pl.BlockSpec((L, 1, H), lambda i: (0, 0, 0),
                         pipeline_mode=resident),                          # b_h
            pl.BlockSpec((1, H), lambda i: (0, 0),
                         pipeline_mode=resident),                          # w_out
            pl.BlockSpec(memory_space=pltpu.MemorySpace.SMEM),             # b_out
        ],
        out_specs=pl.BlockSpec((1, 1, block_b), lambda i: (i, 0, 0)),
        compiler_params=pltpu.CompilerParams(
            dimension_semantics=("parallel",),
            vmem_limit_bytes=vmem_limit,
        ),
        cost_estimate=cost,
    )(x, w_in, b_in, w_h, b_h, w_out, b_out)

    # Lane-dense (n_tiles, 1, block_b) slab -> (B, 1); contiguous reshape.
    return out.reshape(b_pad, 1)[:B]


def init_params(key, dim, n_hidden_layers, n_hidden_nodes):
    """PyTorch-Linear-style init: U(-1/sqrt(fan_in), 1/sqrt(fan_in)), f32."""
    H = n_hidden_nodes
    ks = jax.random.split(key, 6)

    def unif(k, shape, fan_in):
        bound = 1.0 / jnp.sqrt(jnp.asarray(fan_in, jnp.float32))
        return jax.random.uniform(k, shape, jnp.float32, -bound, bound)

    w_in = unif(ks[0], (dim, H), dim)                      # [dim, H]
    b_in = unif(ks[1], (1, H), dim)                        # [1, H]
    w_h = unif(ks[2], (n_hidden_layers, H, H), H)          # [L, H, H]
    b_h = unif(ks[3], (n_hidden_layers, 1, H), H)          # [L, 1, H]
    w_out = unif(ks[4], (1, H), H)                         # [1, H]
    b_out = unif(ks[5], (1, 1), H)                         # [1, 1]
    return (w_in, b_in, w_h, b_h, w_out, b_out)


def reference_forward(x, params, *, compute_dtype=jnp.bfloat16):
    """Pure-JAX reference mirroring the kernel's dtype/accumulation behavior."""
    w_in, b_in, w_h, b_h, w_out, b_out = params
    cdt = jnp.dtype(compute_dtype)
    b_in = jnp.reshape(b_in, (1, -1)).astype(jnp.float32)
    b_h = b_h.astype(jnp.float32)
    b_out = jnp.reshape(b_out, ()).astype(jnp.float32)
    h = jnp.dot(x.astype(cdt), w_in.astype(cdt),
                preferred_element_type=jnp.float32)
    h = jnp.maximum(h + b_in, 0.0)
    for l in range(w_h.shape[0]):
        h = jnp.dot(h.astype(cdt), w_h[l].astype(cdt),
                    preferred_element_type=jnp.float32)
        h = jnp.maximum(h + b_h[l].reshape(1, -1), 0.0)
    w_row = jnp.reshape(w_out, (1, -1)).astype(cdt).astype(jnp.float32)
    logits = h @ w_row.T + b_out
    return jax.nn.sigmoid(logits)


if __name__ == "__main__":
    # TODO(synk): dropout / spectral_norm branches of the module are not
    # implemented (constructor defaults dropout=None, specnorm=None).
    B = 200                 # not a multiple of 128 -> exercises batch padding
    DIM = 16
    N_HIDDEN_LAYERS = 4
    N_HIDDEN_NODES = 128    # lane-aligned hidden width

    key = jax.random.PRNGKey(0)
    k_params, k_x, k_x2 = jax.random.split(key, 3)
    x = jax.random.normal(k_x, (B, DIM), jnp.float32)
    params = init_params(k_params, DIM, N_HIDDEN_LAYERS, N_HIDDEN_NODES)

    # f32 MXU operands (only deltas vs reference: safe-sigmoid formulation and
    # the approximate EUP reciprocal -> loose-but-meaningful tolerance).
    out_f32 = discriminator_forward(x, params, n_hidden_layers=N_HIDDEN_LAYERS,
                                    compute_dtype=jnp.float32)
    out_f32 = jax.block_until_ready(out_f32)
    ref_f32 = reference_forward(x, params, compute_dtype=jnp.float32)
    assert out_f32.shape == (B, 1), out_f32.shape
    assert jnp.allclose(out_f32, ref_f32, atol=1e-2, rtol=1e-2), \
        float(jnp.max(jnp.abs(out_f32 - ref_f32)))

    # Default path: bf16 MXU operands with f32 accumulation.
    out_bf16 = discriminator_forward(x, params, n_hidden_layers=N_HIDDEN_LAYERS)
    out_bf16 = jax.block_until_ready(out_bf16)
    ref_bf16 = reference_forward(x, params, compute_dtype=jnp.bfloat16)
    assert out_bf16.shape == (B, 1), out_bf16.shape
    assert jnp.allclose(out_bf16, ref_bf16, atol=1e-2, rtol=5e-2), \
        float(jnp.max(jnp.abs(out_bf16 - ref_bf16)))

    # Larger batch: exercises the 1024-row tile path and the 2-tile grid.
    x_big = jax.random.normal(k_x2, (2048, DIM), jnp.float32)
    out_big = discriminator_forward(x_big, params,
                                    n_hidden_layers=N_HIDDEN_LAYERS)
    out_big = jax.block_until_ready(out_big)
    ref_big = reference_forward(x_big, params, compute_dtype=jnp.bfloat16)
    assert out_big.shape == (2048, 1), out_big.shape
    assert jnp.allclose(out_big, ref_big, atol=1e-2, rtol=5e-2), \
        float(jnp.max(jnp.abs(out_big - ref_big)))

    print("KERNEL_OK")
</pallas_src>

<mosaic_0001>
module attributes {stable_mosaic.version = 11 : i64} {
  func.func @_mlp_kernel(%arg0: i32, %arg1: memref<128x16xf32, #tpu.memory_space<vmem>>, %arg2: memref<16x128xf32, #tpu.memory_space<vmem>>, %arg3: memref<1x128xf32, #tpu.memory_space<vmem>>, %arg4: memref<4x128x128xf32, #tpu.memory_space<vmem>>, %arg5: memref<4x1x128xf32, #tpu.memory_space<vmem>>, %arg6: memref<1x128xf32, #tpu.memory_space<vmem>>, %arg7: memref<1xf32, #tpu.memory_space<smem>>, %arg8: memref<1x1x128xf32, #tpu.memory_space<vmem>>) attributes {dimension_semantics = [#tpu.dimension_semantics<parallel>], iteration_bounds = array<i64: 2>, scalar_prefetch = 0 : i64, scratch_operands = 0 : i64, tpu.core_type = #tpu.core_type<tc>, window_params = [{transform_indices = @transform_0, window_bounds = array<i64: 128, 16>}, {pipeline_mode = #tpu.pipeline_mode<synchronous>, transform_indices = @transform_1, window_bounds = array<i64: 16, 128>}, {pipeline_mode = #tpu.pipeline_mode<synchronous>, transform_indices = @transform_2, window_bounds = array<i64: 1, 128>}, {pipeline_mode = #tpu.pipeline_mode<synchronous>, transform_indices = @transform_3, window_bounds = array<i64: 4, 128, 128>}, {pipeline_mode = #tpu.pipeline_mode<synchronous>, transform_indices = @transform_4, window_bounds = array<i64: 4, 1, 128>}, {pipeline_mode = #tpu.pipeline_mode<synchronous>, transform_indices = @transform_5, window_bounds = array<i64: 1, 128>}, {transform_indices = @transform_6, window_bounds = array<i64: 1>}, {transform_indices = @transform_7, window_bounds = array<i64: 1, 1, 128>}]} {
    %c0 = arith.constant 0 : index
    %c0_0 = arith.constant 0 : index
    %0 = vector.load %arg1[%c0, %c0_0] : memref<128x16xf32, #tpu.memory_space<vmem>>, vector<128x16xf32>
    %c0_1 = arith.constant 0 : index
    %c0_2 = arith.constant 0 : index
    %1 = vector.load %arg2[%c0_1, %c0_2] : memref<16x128xf32, #tpu.memory_space<vmem>>, vector<16x128xf32>
    %cst = arith.constant dense<0.000000e+00> : vector<128x128xf32>
    %2 = tpu.matmul %0, %1, %cst {dimension_numbers = #tpu.dot_dimension_numbers<[1], [0], [0], [1], [0, 0, 1, 1], [], []>} : vector<128x16xf32>, vector<16x128xf32>, vector<128x128xf32> -> vector<128x128xf32>
    %c0_3 = arith.constant 0 : index
    %c0_4 = arith.constant 0 : index
    %3 = vector.load %arg3[%c0_3, %c0_4] : memref<1x128xf32, #tpu.memory_space<vmem>>, vector<1x128xf32>
    %4 = vector.broadcast %3 : vector<1x128xf32> to vector<128x128xf32>
    %5 = arith.addf %2, %4 : vector<128x128xf32>
    %cst_5 = arith.constant 0.000000e+00 : f32
    %6 = vector.broadcast %cst_5 : f32 to vector<128x128xf32>
    %7 = arith.maximumf %5, %6 : vector<128x128xf32>
    %c0_6 = arith.constant 0 : index
    %c0_7 = arith.constant 0 : index
    %c0_8 = arith.constant 0 : index
    %8 = vector.load %arg4[%c0_6, %c0_7, %c0_8] : memref<4x128x128xf32, #tpu.memory_space<vmem>>, vector<1x128x128xf32>
    %9 = vector.shape_cast %8 : vector<1x128x128xf32> to vector<128x128xf32>
    %cst_9 = arith.constant dense<0.000000e+00> : vector<128x128xf32>
    %10 = tpu.matmul %7, %9, %cst_9 {dimension_numbers = #tpu.dot_dimension_numbers<[1], [0], [0], [1], [0, 0, 1, 1], [], []>} : vector<128x128xf32>, vector<128x128xf32>, vector<128x128xf32> -> vector<128x128xf32>
    %c0_10 = arith.constant 0 : index
    %c0_11 = arith.constant 0 : index
    %c0_12 = arith.constant 0 : index
    %11 = vector.load %arg5[%c0_10, %c0_11, %c0_12] : memref<4x1x128xf32, #tpu.memory_space<vmem>>, vector<1x1x128xf32>
    %12 = vector.shape_cast %11 : vector<1x1x128xf32> to vector<1x128xf32>
    %13 = vector.broadcast %12 : vector<1x128xf32> to vector<128x128xf32>
    %14 = arith.addf %10, %13 : vector<128x128xf32>
    %cst_13 = arith.constant 0.000000e+00 : f32
    %15 = vector.broadcast %cst_13 : f32 to vector<128x128xf32>
    %16 = arith.maximumf %14, %15 : vector<128x128xf32>
    %c1 = arith.constant 1 : index
    %c0_14 = arith.constant 0 : index
    %c0_15 = arith.constant 0 : index
    %17 = vector.load %arg4[%c1, %c0_14, %c0_15] : memref<4x128x128xf32, #tpu.memory_space<vmem>>, vector<1x128x128xf32>
    %18 = vector.shape_cast %17 : vector<1x128x128xf32> to vector<128x128xf32>
    %cst_16 = arith.constant dense<0.000000e+00> : vector<128x128xf32>
    %19 = tpu.matmul %16, %18, %cst_16 {dimension_numbers = #tpu.dot_dimension_numbers<[1], [0], [0], [1], [0, 0, 1, 1], [], []>} : vector<128x128xf32>, vector<128x128xf32>, vector<128x128xf32> -> vector<128x128xf32>
    %c1_17 = arith.constant 1 : index
    %c0_18 = arith.constant 0 : index
    %c0_19 = arith.constant 0 : index
    %20 = vector.load %arg5[%c1_17, %c0_18, %c0_19] : memref<4x1x128xf32, #tpu.memory_space<vmem>>, vector<1x1x128xf32>
    %21 = vector.shape_cast %20 : vector<1x1x128xf32> to vector<1x128xf32>
    %22 = vector.broadcast %21 : vector<1x128xf32> to vector<128x128xf32>
    %23 = arith.addf %19, %22 : vector<128x128xf32>
    %cst_20 = arith.constant 0.000000e+00 : f32
    %24 = vector.broadcast %cst_20 : f32 to vector<128x128xf32>
    %25 = arith.maximumf %23, %24 : vector<128x128xf32>
    %c2 = arith.constant 2 : index
    %c0_21 = arith.constant 0 : index
    %c0_22 = arith.constant 0 : index
    %26 = vector.load %arg4[%c2, %c0_21, %c0_22] : memref<4x128x128xf32, #tpu.memory_space<vmem>>, vector<1x128x128xf32>
    %27 = vector.shape_cast %26 : vector<1x128x128xf32> to vector<128x128xf32>
    %cst_23 = arith.constant dense<0.000000e+00> : vector<128x128xf32>
    %28 = tpu.matmul %25, %27, %cst_23 {dimension_numbers = #tpu.dot_dimension_numbers<[1], [0], [0], [1], [0, 0, 1, 1], [], []>} : vector<128x128xf32>, vector<128x128xf32>, vector<128x128xf32> -> vector<128x128xf32>
    %c2_24 = arith.constant 2 : index
    %c0_25 = arith.constant 0 : index
    %c0_26 = arith.constant 0 : index
    %29 = vector.load %arg5[%c2_24, %c0_25, %c0_26] : memref<4x1x128xf32, #tpu.memory_space<vmem>>, vector<1x1x128xf32>
    %30 = vector.shape_cast %29 : vector<1x1x128xf32> to vector<1x128xf32>
    %31 = vector.broadcast %30 : vector<1x128xf32> to vector<128x128xf32>
    %32 = arith.addf %28, %31 : vector<128x128xf32>
    %cst_27 = arith.constant 0.000000e+00 : f32
    %33 = vector.broadcast %cst_27 : f32 to vector<128x128xf32>
    %34 = arith.maximumf %32, %33 : vector<128x128xf32>
    %c3 = arith.constant 3 : index
    %c0_28 = arith.constant 0 : index
    %c0_29 = arith.constant 0 : index
    %35 = vector.load %arg4[%c3, %c0_28, %c0_29] : memref<4x128x128xf32, #tpu.memory_space<vmem>>, vector<1x128x128xf32>
    %36 = vector.shape_cast %35 : vector<1x128x128xf32> to vector<128x128xf32>
    %cst_30 = arith.constant dense<0.000000e+00> : vector<128x128xf32>
    %37 = tpu.matmul %34, %36, %cst_30 {dimension_numbers = #tpu.dot_dimension_numbers<[1], [0], [0], [1], [0, 0, 1, 1], [], []>} : vector<128x128xf32>, vector<128x128xf32>, vector<128x128xf32> -> vector<128x128xf32>
    %c3_31 = arith.constant 3 : index
    %c0_32 = arith.constant 0 : index
    %c0_33 = arith.constant 0 : index
    %38 = vector.load %arg5[%c3_31, %c0_32, %c0_33] : memref<4x1x128xf32, #tpu.memory_space<vmem>>, vector<1x1x128xf32>
    %39 = vector.shape_cast %38 : vector<1x1x128xf32> to vector<1x128xf32>
    %40 = vector.broadcast %39 : vector<1x128xf32> to vector<128x128xf32>
    %41 = arith.addf %37, %40 : vector<128x128xf32>
    %cst_34 = arith.constant 0.000000e+00 : f32
    %42 = vector.broadcast %cst_34 : f32 to vector<128x128xf32>
    %43 = arith.maximumf %41, %42 : vector<128x128xf32>
    %c0_35 = arith.constant 0 : index
    %c0_36 = arith.constant 0 : index
    %44 = vector.load %arg6[%c0_35, %c0_36] : memref<1x128xf32, #tpu.memory_space<vmem>>, vector<1x128xf32>
    "tpu.trace_start"() <{level = 10 : i32, message = "oh,bh->ob"}> : () -> ()
    %cst_37 = arith.constant dense<0.000000e+00> : vector<1x128xf32>
    %45 = tpu.matmul %44, %43, %cst_37 {dimension_numbers = #tpu.dot_dimension_numbers<[1], [1], [0], [0], [0, 0, 1, 0], [], []>} : vector<1x128xf32>, vector<128x128xf32>, vector<1x128xf32> -> vector<1x128xf32>
    "tpu.trace_stop"() : () -> ()
    %c0_38 = arith.constant 0 : index
    %46 = memref.load %arg7[%c0_38] : memref<1xf32, #tpu.memory_space<smem>>
    %47 = vector.broadcast %46 : f32 to vector<1x128xf32>
    %48 = arith.addf %45, %47 : vector<1x128xf32>
    %49 = math.absf %48 : vector<1x128xf32>
    %cst_39 = arith.constant 0.000000e+00 : f32
    %50 = vector.broadcast %cst_39 : f32 to vector<1x128xf32>
    %51 = arith.subf %50, %49 : vector<1x128xf32>
    %52 = math.exp %51 : vector<1x128xf32>
    %cst_40 = arith.constant 1.000000e+00 : f32
    %53 = vector.broadcast %cst_40 : f32 to vector<1x128xf32>
    %54 = arith.addf %53, %52 : vector<1x128xf32>
    %55 = tpu.reciprocal %54 {approx = true} : vector<1x128xf32> -> vector<1x128xf32>
    %cst_41 = arith.constant 0.000000e+00 : f32
    %56 = vector.broadcast %cst_41 : f32 to vector<1x128xf32>
    %57 = arith.cmpf oge, %48, %56 : vector<1x128xf32>
    %58 = arith.mulf %52, %55 : vector<1x128xf32>
    %59 = arith.select %57, %55, %58 : vector<1x128xi1>, vector<1x128xf32>
    %60 = vector.shape_cast %59 : vector<1x128xf32> to vector<1x1x128xf32>
    %c0_42 = arith.constant 0 : index
    %c0_43 = arith.constant 0 : index
    %c0_44 = arith.constant 0 : index
    %61 = vector.load %arg8[%c0_42, %c0_43, %c0_44] : memref<1x1x128xf32, #tpu.memory_space<vmem>>, vector<1x1x128xf32>
    tpu.vector_store %arg8[%c0_42, %c0_43, %c0_44], %60 {strides = array<i32>} : memref<1x1x128xf32, #tpu.memory_space<vmem>>, vector<1x1x128xf32>,
    return
  }
  func.func @transform_0(%arg0: i32) -> (i32, i32) {
    %c0_i32 = arith.constant 0 : i32
    %c0_i32_0 = arith.constant 0 : i32
    return %arg0, %c0_i32 : i32, i32
  }
  func.func @transform_1(%arg0: i32) -> (i32, i32) {
    %c0_i32 = arith.constant 0 : i32
    %c0_i32_0 = arith.constant 0 : i32
    %c0_i32_1 = arith.constant 0 : i32
    return %c0_i32, %c0_i32_0 : i32, i32
  }
  func.func @transform_2(%arg0: i32) -> (i32, i32) {
    %c0_i32 = arith.constant 0 : i32
    %c0_i32_0 = arith.constant 0 : i32
    %c0_i32_1 = arith.constant 0 : i32
    return %c0_i32, %c0_i32_0 : i32, i32
  }
  func.func @transform_3(%arg0: i32) -> (i32, i32, i32) {
    %c0_i32 = arith.constant 0 : i32
    %c0_i32_0 = arith.constant 0 : i32
    %c0_i32_1 = arith.constant 0 : i32
    %c0_i32_2 = arith.constant 0 : i32
    return %c0_i32, %c0_i32_0, %c0_i32_1 : i32, i32, i32
  }
  func.func @transform_4(%arg0: i32) -> (i32, i32, i32) {
    %c0_i32 = arith.constant 0 : i32
    %c0_i32_0 = arith.constant 0 : i32
    %c0_i32_1 = arith.constant 0 : i32
    %c0_i32_2 = arith.constant 0 : i32
    return %c0_i32, %c0_i32_0, %c0_i32_1 : i32, i32, i32
  }
  func.func @transform_5(%arg0: i32) -> (i32, i32) {
    %c0_i32 = arith.constant 0 : i32
    %c0_i32_0 = arith.constant 0 : i32
    %c0_i32_1 = arith.constant 0 : i32
    return %c0_i32, %c0_i32_0 : i32, i32
  }
  func.func @transform_6(%arg0: i32) -> i32 {
    %c0_i32 = arith.constant 0 : i32
    %c0_i32_0 = arith.constant 0 : i32
    return %c0_i32 : i32
  }
  func.func @transform_7(%arg0: i32) -> (i32, i32, i32) {
    %c0_i32 = arith.constant 0 : i32
    %c0_i32_0 = arith.constant 0 : i32
    %c0_i32_1 = arith.constant 0 : i32
    return %arg0, %c0_i32, %c0_i32_0 : i32, i32, i32
  }
}

</mosaic_0001>

<bundles_post_ra>
// kernel: tpu_custom_call.1
= control target key start
LH: loop header
LB: loop body
LE: loop exit
PB: predicated region body
PF: predicated region fallthrough
CT: control target
= control target key end

     0   :  { %s1415_s0 = inlined_call_operand.vmem [shape: f32[256,16], index: 0, kind: input, shape index: {}]   ;;  %s1416_s1 = inlined_call_operand.vmem [shape: f32[16,128], index: 1, kind: input, shape index: {}]   ;;  %s1417_s2 = inlined_call_operand.vmem [shape: f32[1,128], index: 2, kind: input, shape index: {}]   ;;  %s1418_s3 = inlined_call_operand.hbm [shape: f32[4,128,128], index: 3, kind: input, shape index: {}]   ;;  %s1419_s4 = inlined_call_operand.vmem [shape: f32[4,1,128], index: 4, kind: input, shape index: {}]   ;;  %s1420_s5 = inlined_call_operand.vmem [shape: f32[1,128], index: 5, kind: input, shape index: {}]   ;;  %s1421_s6 = inlined_call_operand.<no memory space> [shape: f32[1], index: 6, kind: input, shape index: {}]   ;;  %s1422_s7 = inlined_call_operand.hbm [shape: f32[2,1,128], index: 7, kind: output, shape index: {}]  }
   0x1   :  { %12 = sst [smem:[#allocation2]] %s1421_s6 }
   0x2   :  { %13 = vsyncpa [#allocation4], 0 }
   0x3   :  { %14 = vsyncpa [#allocation5], 0 }
   0x4   :  { %16 = vsyncpa [#allocation5 + $0x1], 0  ;;  %s1209_s26 = smov 0   ;;  %s1211_s27 = smov 0  }
   0x5   :  { %s1213_s28 = smov 0   ;;  %s1215_s29 = smov 0  }
   0x6 LB: > { %s1230_s6 = sadd.s32 4294967295, %s1161_s29   ;;  %s971_s30 = sadd.s32 4294967294, %s1161_s29   ;;  %s1161_s29 = sphi %s1215_s29, %s1428_s29   ;;  %s1157_s28 = sphi %s1213_s28, %s1427_s28   ;;  %s1153_s27 = sphi %s1211_s27, %s1426_s27   ;;  %s1149_s26 = sphi %s1209_s26, %s1425_s26  }
   0x7   : > { %s1234_s8 = sadd.s32 1, %s1161_s29   ;;  %s181_s9 = sadd.s32 1, %s1157_s28 }
   0x8   : > { %s178_s10 = ssub.s32 %s1161_s29, %s1234_s8  ;;  %p191_p0 = scmp.ne.s32.totalorder %s1157_s28, %s1153_s27 }
   0x9   : > { %p179_p1 = scmp.eq.s32.totalorder %s178_s10, 0  ;;  %p192_p2 = scmp.eq.s32.totalorder %s1230_s6, 1 }
   0xa   : > { %p197_p3 = scmp.ne.s32.totalorder %s1153_s27, %s1149_s26  ;;  %p198_p4 = scmp.eq.s32.totalorder %s971_s30, 1 }
   0xb   : > { %s1245_s11 = scalar_select %p179_p1, %s1157_s28, %s181_s9  }
   0xc   : > { %p1247_p5 = por %p192_p2, %p191_p0  ;;  %p1251_p6 = por %p198_p4, %p197_p3 }
   0xd   : > { %p972_p7 = scmp.ge.s32.totalorder %s1161_s29, 1  ;;  %p205_p8 = scmp.lt.s32.totalorder %s1161_s29, 3 }
   0xe   : > { %p1018_p9 = scmp.eq.s32.totalorder %s1230_s6, 0  ;;  %s222_s16 = sshll.u32 %s1418_s3, 4  ;;  %s223_s16 = int_to_ptr.hbm [resolvable:$true] %s222_s16 }
   0xf   : > { %p206_p10 = pnand %p972_p7, %p205_p8  ;;  %s1163_s17 = smov [#allocation3]  }
  0x10   : > { %s224_s18 = sshll.u32 %s1163_s17, 4  ;;  %s1164_s19 = smov 128   ;;  %s225_s18 = int_to_ptr.vmem [resolvable:$true] %s224_s18 }
  0x11   : > { %p1010_p11 = pneg %p206_p10  ;;  %s1165_s20 = smov 8  }
  0x12   : > { %258 = sbr.rel (%p206_p10) target bundleno = 1032 (0x408), region = 48 }
  0x13   : > { %p1011_p12 = pnand %p1018_p9, %p1010_p11 }
  0x15   : > { %1013 = dma.hbm_to_vmem [thread:$0]  (!%p1011_p12), %s223_s16, 8192, %s225_s18, [#allocation4], %s1164_s19, %s1164_s19, %s1165_s20  }
  0x17   : > { %1140 = dma.done.wait (%p1018_p9), [#allocation4], 8192  }
  0x18   : > { %1142 = vsyncadd (%p1018_p9), [#allocation4], 4294959104  ;;  %s977_s21 = sshll.u32 %s1230_s6, 4  ;;  %v313_v0 = vld [vmem:[%s1416_s1 + $0x8] sm:$0xff]  ;;  %v312_v1 = vld [vmem:[%s1416_s1] sm:$0xff]  ;;  %vm318_vm0 = vcmask 130048   ;;  %s900_s16 = scalar_lea.hbm %s1422_s7, %s1230_s6 }
  0x19   : > { %p291_p13 = scmp.lt.s32.totalorder %s977_s21, 31  ;;  %381 = vmatpush.msra.mxu0 %v313_v0  ;;  %1000 = vmatpush.msra.mxu2 %v313_v0  ;;  %v463_v6 = vld [vmem:[#allocation3 + $0x78] sm:$0xff]  ;;  %v462_v7 = vld [vmem:[#allocation3 + $0x70] sm:$0xff]  ;;  %v461_v8 = vld [vmem:[#allocation3 + $0x68] sm:$0xff]  ;;  %s859_s9 = sld [smem:[#allocation2]] }
  0x1a   : > { %1001 = vmatpush.msra.mxu3 %v313_v0  ;;  %468 = vmatpush.msra.mxu1 %v463_v6  ;;  %v460_v11 = vld [vmem:[#allocation3 + $0x60] sm:$0xff]  ;;  %v459_v13 = vld [vmem:[#allocation3 + $0x58] sm:$0xff]  ;;  %v458_v14 = vld [vmem:[#allocation3 + $0x50] sm:$0xff]  ;;  %s288_s10 = sand.u32 1, %s1153_s27   ;;  %s904_s19 = sshll.u32 %s900_s16, 4  ;;  %s905_s19 = int_to_ptr.hbm [resolvable:$true] %s904_s19 }
  0x1b   : > { %s1430_s21 = smov (!%p291_p13, %s977_s21), 31  ;;  %382 = vmatpush.msra.mxu0 %v312_v1  ;;  %1002 = vmatpush.msra.mxu2 %v312_v1  ;;  %v457_v15 = vld [vmem:[#allocation3 + $0x48] sm:$0xff]  ;;  %v456_v18 = vld [vmem:[#allocation3 + $0x40] sm:$0xff]  ;;  %v455_v20 = vld [vmem:[#allocation3 + $0x38] sm:$0xff]  ;;  %s289_s17 = scalar_lea.vmem [#allocation6], %s288_s10 }
  0x1c   : > { %s978_s22 = sshll.u32 %s1430_s21, 3  ;;  %1003 = vmatpush.msra.mxu3 %v312_v1  ;;  %469 = vmatpush.msra.mxu1 %v462_v7  ;;  %v454_v21 = vld [vmem:[#allocation3 + $0x30] sm:$0xff]  ;;  %v453_v22 = vld [vmem:[#allocation3 + $0x28] sm:$0xff]  ;;  %v452_v25 = vld [vmem:[#allocation3 + $0x20] sm:$0xff]  ;;  %s902_s18 = sshll.u32 %s289_s17, 4  ;;  %s903_s18 = int_to_ptr.vmem [resolvable:$true] %s902_s18 }
  0x1d   : > { %s1271_s25 = scalar_lea.vmem %s1415_s0, %s978_s22  ;;  %v451_v27 = vld [vmem:[#allocation3 + $0x18] sm:$0xff]  ;;  %v450_v31 = vld [vmem:[#allocation3 + $0x10] sm:$0xff]  ;;  %v449_v32 = vld [vmem:[#allocation3 + $0x8] sm:$0xff]  ;;  %s892_s20 = scalar_lea.sflag [#allocation5], %s288_s10 }
  0x1e   : > { %v296_v2 = vld [vmem:[%s1271_s25] sm:$0xff]  ;;  %v297_v3 = vld [vmem:[%s1271_s25 + $0x8] sm:$0xff]  ;;  %v302_v4 = vld [vmem:[%s1271_s25 + $0x30] sm:$0xff]  ;;  %470 = vmatpush.msra.mxu1 %v461_v8  ;;  %s1109_s21 = sshra.s32 %s905_s19, 4  ;;  %s1115_s24 = scalar_lea.hbm %s1422_s7, 2  ;;  %s1110_s21 = int_to_ptr.hbm [resolvable:$true] %s1109_s21 }
  0x1f   : > { %979 = vmatmul.msk.f32.vlgmr.msra.gmra.mxu0 %vm318_vm0, %v296_v2  ;;  %985 = vmatmul.msk.f32.vlgmr.msra.gmra.mxu2 %vm318_vm0, %v302_v4  ;;  %v306_v5 = vld [vmem:[%s1271_s25 + $0x50] sm:$0xff]  ;;  %v303_v10 = vld [vmem:[%s1271_s25 + $0x38] sm:$0xff]  ;;  %v304_v17 = vld [vmem:[%s1271_s25 + $0x40] sm:$0xff]  ;;  %s1111_s22 = scalar_lea.hbm %s1110_s21, 1  ;;  %p1116_p3 = scmp.lt.s32.totalorder %s1110_s21, %s1422_s7 }
  0x20   : > { %989 = vmatmul.msk.f32.vlgmr.msra.gmra.mxu3 %vm318_vm0, %v306_v5  ;;  %v298_v9 = vld [vmem:[%s1271_s25 + $0x10] sm:$0xff]  ;;  %v307_v12 = vld [vmem:[%s1271_s25 + $0x58] sm:$0xff]  ;;  %471 = vmatpush.msra.mxu1 %v460_v11  ;;  %v308_v19 = vld [vmem:[%s1271_s25 + $0x60] sm:$0xff]  ;;  %p1112_p0 = scmp.ne.s32.totalorder %s1110_s21, %s1111_s22  ;;  %p1117_p4 = scmp.lt.s32.totalorder %s1115_s24, %s1111_s22 }
  0x21   : > { %v299_v16 = vld [vmem:[%s1271_s25 + $0x18] sm:$0xff]  ;;  %v300_v23 = vld [vmem:[%s1271_s25 + $0x20] sm:$0xff]  ;;  %v305_v24 = vld [vmem:[%s1271_s25 + $0x48] sm:$0xff] }
  0x22   : > { %472 = vmatpush.msra.mxu1 %v459_v13  ;;  %v309_v26 = vld [vmem:[%s1271_s25 + $0x68] sm:$0xff]  ;;  %v310_v29 = vld [vmem:[%s1271_s25 + $0x70] sm:$0xff]  ;;  %v311_v30 = vld [vmem:[%s1271_s25 + $0x78] sm:$0xff]  ;;  %p1113_p1 = pnand %p1112_p0, %p1247_p5  ;;  %p1118_p7 = por %p1117_p4, %p1116_p3 }
  0x23   : > { %v301_v28 = vld [vmem:[%s1271_s25 + $0x28] sm:$0xff]  ;;  %v448_v33 = vld [vmem:[#allocation3] sm:$0xff]  ;;  %v565_v1 = vld [vmem:[#allocation3 + $0xf8] sm:$0xff] }
  0x24   : > { %473 = vmatpush.msra.mxu1 %v458_v14  ;;  %v1314_v34 = vld [vmem:[%s1417_s2] ss:$0 sm:$0xff]  ;;  %v564_v2 = vld [vmem:[#allocation3 + $0xf0] sm:$0xff]  ;;  %571 = vmatpush.msrb.mxu2 %v565_v1  ;;  %v561_v8 = vld [vmem:[#allocation3 + $0xd8] sm:$0xff]  ;;  %p1114_p2 = pneg %p1113_p1 }
  0x25   : > { %v562_v7 = vld [vmem:[#allocation3 + $0xe0] sm:$0xff]  ;;  %v559_v11 = vld [vmem:[#allocation3 + $0xc8] sm:$0xff] }
  0x26   : > { %474 = vmatpush.msra.mxu1 %v457_v15  ;;  %572 = vmatpush.msrb.mxu2 %v564_v2  ;;  %v558_v14 = vld [vmem:[#allocation3 + $0xc0] sm:$0xff]  ;;  %v557_v15 = vld [vmem:[#allocation3 + $0xb8] sm:$0xff]  ;;  %p1119_p8 = pnand %p1118_p7, %p1114_p2 }
  0x27   : > { %980 = vmatmul.msk.f32.gmra.mxu0 %vm318_vm0, %v297_v3  ;;  %986 = vmatmul.msk.f32.gmra.mxu2 %vm318_vm0, %v303_v10  ;;  %v563_v3 = vld [vmem:[#allocation3 + $0xe8] sm:$0xff]  ;;  %v668_v2 = vld [vmem:[#allocation3 + $0x178] sm:$0xff] }
  0x28   : > { %990 = vmatmul.msk.f32.gmra.mxu3 %vm318_vm0, %v307_v12  ;;  %475 = vmatpush.msra.mxu1 %v456_v18  ;;  %v555_v18 = vld [vmem:[#allocation3 + $0xa8] sm:$0xff] }
  0x29   : > { %573 = vmatpush.msrb.mxu2 %v563_v3  ;;  %674 = vmatpush.msrb.mxu3 %v668_v2  ;;  %v667_v3 = vld [vmem:[#allocation3 + $0x170] sm:$0xff] }
  0x2a   : > { %476 = vmatpush.msra.mxu1 %v455_v20  ;;  %v554_v20 = vld [vmem:[#allocation3 + $0xa0] sm:$0xff] }
  0x2b   : > { %574 = vmatpush.msrb.mxu2 %v562_v7  ;;  %675 = vmatpush.msrb.mxu3 %v667_v3  ;;  %v771_v3 = vld [vmem:[#allocation3 + $0x1f8] sm:$0xff] }
  0x2c   : > { %477 = vmatpush.msra.mxu1 %v454_v21  ;;  %v553_v21 = vld [vmem:[#allocation3 + $0x98] sm:$0xff]  ;;  %777 = vmatpush.msrb.mxu0 %v771_v3 }
  0x2d   : > { %575 = vmatpush.msrb.mxu2 %v561_v8  ;;  %v665_v8 = vld [vmem:[#allocation3 + $0x160] sm:$0xff] }
  0x2e   : > { %478 = vmatpush.msra.mxu1 %v453_v22 }
  0x2f   : > { %981 = vmatmul.msk.f32.gmra.mxu0 %vm318_vm0, %v298_v9  ;;  %987 = vmatmul.msk.f32.gmra.mxu2 %vm318_vm0, %v304_v17  ;;  %v560_v9 = vld [vmem:[#allocation3 + $0xd0] sm:$0xff] }
  0x30   : > { %991 = vmatmul.msk.f32.gmra.mxu3 %vm318_vm0, %v308_v19  ;;  %479 = vmatpush.msra.mxu1 %v452_v25  ;;  %v551_v25 = vld [vmem:[#allocation3 + $0x88] sm:$0xff] }
  0x31   : > { %576 = vmatpush.msrb.mxu2 %v560_v9  ;;  %v664_v9 = vld [vmem:[#allocation3 + $0x158] sm:$0xff] }
  0x32   : > { %480 = vmatpush.msra.mxu1 %v451_v27  ;;  %v550_v27 = vld [vmem:[#allocation3 + $0x80] sm:$0xff] }
  0x33   : > { %577 = vmatpush.msrb.mxu2 %v559_v11 }
  0x34   : > { %481 = vmatpush.msra.mxu1 %v450_v31 }
  0x35   : > { %578 = vmatpush.msrb.mxu2 %v558_v14 }
  0x36   : > { %482 = vmatpush.msra.mxu1 %v449_v32 }
  0x37   : > { %982 = vmatmul.msk.f32.gmra.mxu0 %vm318_vm0, %v299_v16  ;;  %988 = vmatmul.msk.f32.gmra.mxu2 %vm318_vm0, %v305_v24  ;;  %v556_v16 = vld [vmem:[#allocation3 + $0xb0] sm:$0xff] }
  0x38   : > { %992 = vmatmul.msk.f32.gmra.mxu3 %vm318_vm0, %v309_v26  ;;  %483 = vmatpush.msra.mxu1 %v448_v33  ;;  %v552_v24 = vld [vmem:[#allocation3 + $0x90] sm:$0xff] }
  0x39   : > { %579 = vmatpush.msrb.mxu2 %v557_v15  ;;  %v661_v15 = vld [vmem:[#allocation3 + $0x140] sm:$0xff] }
  0x3b   : > { %580 = vmatpush.msrb.mxu2 %v556_v16  ;;  %v660_v16 = vld [vmem:[#allocation3 + $0x138] sm:$0xff] }
  0x3d   : > { %581 = vmatpush.msrb.mxu2 %v555_v18  ;;  %v658_v18 = vld [vmem:[#allocation3 + $0x128] sm:$0xff] }
  0x3f   : > { %983 = vmatmul.msk.f32.gmra.mxu0 %vm318_vm0, %v300_v23  ;;  %582 = vmatpush.msrb.mxu2 %v554_v20 }
  0x40   : > { %993 = vmatmul.msk.f32.gmra.mxu3 %vm318_vm0, %v310_v29 }
  0x41   : > { %583 = vmatpush.msrb.mxu2 %v553_v21  ;;  %v657_v21 = vld [vmem:[#allocation3 + $0x120] sm:$0xff] }
  0x43   : > { %584 = vmatpush.msrb.mxu2 %v552_v24  ;;  %v655_v24 = vld [vmem:[#allocation3 + $0x110] sm:$0xff] }
  0x45   : > { %585 = vmatpush.msrb.mxu2 %v551_v25 }
  0x47   : > { %984 = vmatmul.msk.f32.gmra.mxu0 %vm318_vm0, %v301_v28  ;;  %586 = vmatpush.msrb.mxu2 %v550_v27  ;;  %v654_v27 = vld [vmem:[#allocation3 + $0x108] sm:$0xff] }
  0x48   : > { %994 = vmatmul.msk.f32.gmra.mxu3 %vm318_vm0, %v311_v30 }
  0x9c   : > { %v384_v35 = vpop.f32.mrf.mxu0 }
  0x9d   : > { %v385_v36 = vadd.f32 %v1314_v34, %v384_v35 }
  0x9f   : > { %v432_v37 = vmax.f32 %v385_v36, 0.0  ;;  %v1335_v36 = vld [vmem:[%s1419_s4] ss:$0 sm:$0xff] }
  0xa1   : > { %484 = vmatmul.f32.vlgmr.msra.gmra.mxu1 %v432_v37 }
  0xa2   : > { %v402_v50 = vpop.f32.mrf.mxu2 }
  0xa3   : > { %v403_v54 = vadd.f32 %v1314_v34, %v402_v50  ;;  %v414_v61 = vpop.f32.mrf.mxu3 }
  0xa4   : > { %v387_v38 = vpop.f32.mrf.mxu0  ;;  %v415_v6 = vadd.f32 %v1314_v34, %v414_v61 }
  0xa5   : > { %v388_v39 = vadd.f32 %v1314_v34, %v387_v38  ;;  %v438_v56 = vmax.f32 %v403_v54, 0.0 }
  0xa6   : > { %v442_v10 = vmax.f32 %v415_v6, 0.0  ;;  %v666_v6 = vld [vmem:[#allocation3 + $0x168] sm:$0xff] }
  0xa7   : > { %v433_v40 = vmax.f32 %v388_v39, 0.0  ;;  %676 = vmatpush.msrb.mxu3 %v666_v6 }
  0xa9   : > { %487 = vmatmul.f32.gmra.mxu1 %v433_v40  ;;  %677 = vmatpush.msrb.mxu3 %v665_v8 }
  0xaa   : > { %v405_v55 = vpop.f32.mrf.mxu2 }
  0xab   : > { %v406_v57 = vadd.f32 %v1314_v34, %v405_v55  ;;  %v417_v5 = vpop.f32.mrf.mxu3  ;;  %678 = vmatpush.msrb.mxu3 %v664_v9  ;;  %v768_v9 = vld [vmem:[#allocation3 + $0x1e0] sm:$0xff] }
  0xac   : > { %v390_v41 = vpop.f32.mrf.mxu0  ;;  %v418_v13 = vadd.f32 %v1314_v34, %v417_v5 }
  0xad   : > { %v391_v42 = vadd.f32 %v1314_v34, %v390_v41  ;;  %v439_v59 = vmax.f32 %v406_v57, 0.0 }
  0xae   : > { %v443_v17 = vmax.f32 %v418_v13, 0.0  ;;  %v662_v13 = vld [vmem:[#allocation3 + $0x148] sm:$0xff] }
  0xaf   : > { %v434_v43 = vmax.f32 %v391_v42, 0.0 }
  0xb1   : > { %490 = vmatmul.f32.gmra.mxu1 %v434_v43 }
  0xb2   : > { %v408_v58 = vpop.f32.mrf.mxu2 }
  0xb3   : > { %v409_v60 = vadd.f32 %v1314_v34, %v408_v58  ;;  %v420_v12 = vpop.f32.mrf.mxu3 }
  0xb4   : > { %v393_v44 = vpop.f32.mrf.mxu0  ;;  %v421_v19 = vadd.f32 %v1314_v34, %v420_v12 }
  0xb5   : > { %v394_v45 = vadd.f32 %v1314_v34, %v393_v44  ;;  %v440_v62 = vmax.f32 %v409_v60, 0.0 }
  0xb6   : > { %v444_v23 = vmax.f32 %v421_v19, 0.0 }
  0xb7   : > { %v435_v46 = vmax.f32 %v394_v45, 0.0 }
  0xb9   : > { %493 = vmatmul.f32.gmra.mxu1 %v435_v46 }
  0xba   : > { %v411_v63 = vpop.f32.mrf.mxu2 }
  0xbb   : > { %v412_v0 = vadd.f32 %v1314_v34, %v411_v63  ;;  %v423_v22 = vpop.f32.mrf.mxu3 }
  0xbc   : > { %v396_v47 = vpop.f32.mrf.mxu0  ;;  %v424_v26 = vadd.f32 %v1314_v34, %v423_v22 }
  0xbd   : > { %v397_v48 = vadd.f32 %v1314_v34, %v396_v47  ;;  %v441_v4 = vmax.f32 %v412_v0, 0.0 }
  0xbe   : > { %v445_v29 = vmax.f32 %v424_v26, 0.0 }
  0xbf   : > { %v436_v49 = vmax.f32 %v397_v48, 0.0 }
  0xc1   : > { %496 = vmatmul.f32.gmra.mxu1 %v436_v49 }
  0xc3   : > { %v426_v28 = vpop.f32.mrf.mxu3 }
  0xc4   : > { %v399_v51 = vpop.f32.mrf.mxu0  ;;  %v427_v30 = vadd.f32 %v1314_v34, %v426_v28 }
  0xc5   : > { %v400_v52 = vadd.f32 %v1314_v34, %v399_v51 }
  0xc6   : > { %v446_v31 = vmax.f32 %v427_v30, 0.0 }
  0xc7   : > { %v437_v53 = vmax.f32 %v400_v52, 0.0 }
  0xc9   : > { %499 = vmatmul.f32.gmra.mxu1 %v437_v53 }
  0xcb   : > { %v429_v32 = vpop.f32.mrf.mxu3 }
  0xcc   : > { %v430_v33 = vadd.f32 %v1314_v34, %v429_v32 }
  0xce   : > { %v447_v35 = vmax.f32 %v430_v33, 0.0 }
  0xd1   : > { %502 = vmatmul.f32.gmra.mxu1 %v438_v56 }
  0xd9   : > { %505 = vmatmul.f32.gmra.mxu1 %v439_v59 }
  0xe1   : > { %508 = vmatmul.f32.gmra.mxu1 %v440_v62 }
  0xe9   : > { %511 = vmatmul.f32.gmra.mxu1 %v441_v4 }
  0xf1   : > { %514 = vmatmul.f32.gmra.mxu1 %v442_v10  ;;  %v663_v10 = vld [vmem:[#allocation3 + $0x150] sm:$0xff] }
  0xf2   : > { %679 = vmatpush.msrb.mxu3 %v663_v10  ;;  %v767_v10 = vld [vmem:[#allocation3 + $0x1d8] sm:$0xff] }
  0xf4   : > { %680 = vmatpush.msrb.mxu3 %v662_v13 }
  0xf6   : > { %681 = vmatpush.msrb.mxu3 %v661_v15 }
  0xf8   : > { %682 = vmatpush.msrb.mxu3 %v660_v16  ;;  %v764_v16 = vld [vmem:[#allocation3 + $0x1c0] sm:$0xff] }
  0xf9   : > { %517 = vmatmul.f32.gmra.mxu1 %v443_v17  ;;  %v659_v17 = vld [vmem:[#allocation3 + $0x130] sm:$0xff] }
  0xfa   : > { %683 = vmatpush.msrb.mxu3 %v659_v17  ;;  %v763_v17 = vld [vmem:[#allocation3 + $0x1b8] sm:$0xff] }
  0xfc   : > { %684 = vmatpush.msrb.mxu3 %v658_v18  ;;  %v762_v18 = vld [vmem:[#allocation3 + $0x1b0] sm:$0xff] }
  0xfe   : > { %685 = vmatpush.msrb.mxu3 %v657_v21 }
 0x101   : > { %520 = vmatmul.f32.gmra.mxu1 %v444_v23  ;;  %v656_v23 = vld [vmem:[#allocation3 + $0x118] sm:$0xff] }
 0x102   : > { %686 = vmatpush.msrb.mxu3 %v656_v23 }
 0x104   : > { %687 = vmatpush.msrb.mxu3 %v655_v24  ;;  %v759_v24 = vld [vmem:[#allocation3 + $0x198] sm:$0xff] }
 0x106   : > { %688 = vmatpush.msrb.mxu3 %v654_v27 }
 0x109   : > { %523 = vmatmul.f32.gmra.mxu1 %v445_v29  ;;  %v653_v29 = vld [vmem:[#allocation3 + $0x100] sm:$0xff] }
 0x10a   : > { %689 = vmatpush.msrb.mxu3 %v653_v29 }
 0x111   : > { %526 = vmatmul.f32.gmra.mxu1 %v446_v31 }
 0x119   : > { %529 = vmatmul.f32.gmra.mxu1 %v447_v35 }
 0x11e   : > { %v485_v37 = vpop.f32.mrf.mxu1 }
 0x11f   : > { %v486_v38 = vadd.f32 %v1335_v36, %v485_v37 }
 0x121   : > { %v533_v39 = vmax.f32 %v486_v38, 0.0  ;;  %v1356_v38 = vld [vmem:[%s1419_s4 + $0x1] ss:$0 sm:$0xff] }
 0x123   : > { %587 = vmatmul.f32.vlgmr.msrb.gmra.mxu2 %v533_v39 }
 0x126   : > { %v488_v40 = vpop.f32.mrf.mxu1 }
 0x127   : > { %v489_v41 = vadd.f32 %v1335_v36, %v488_v40 }
 0x129   : > { %v534_v42 = vmax.f32 %v489_v41, 0.0 }
 0x12b   : > { %590 = vmatmul.f32.gmra.mxu2 %v534_v42 }
 0x12e   : > { %v491_v43 = vpop.f32.mrf.mxu1 }
 0x12f   : > { %v492_v34 = vadd.f32 %v1335_v36, %v491_v43 }
 0x131   : > { %v535_v44 = vmax.f32 %v492_v34, 0.0 }
 0x133   : > { %593 = vmatmul.f32.gmra.mxu2 %v535_v44 }
 0x136   : > { %v494_v45 = vpop.f32.mrf.mxu1 }
 0x137   : > { %v495_v46 = vadd.f32 %v1335_v36, %v494_v45 }
 0x139   : > { %v536_v47 = vmax.f32 %v495_v46, 0.0 }
 0x13b   : > { %596 = vmatmul.f32.gmra.mxu2 %v536_v47 }
 0x13e   : > { %v497_v48 = vpop.f32.mrf.mxu1 }
 0x13f   : > { %v498_v49 = vadd.f32 %v1335_v36, %v497_v48 }
 0x141   : > { %v537_v50 = vmax.f32 %v498_v49, 0.0 }
 0x143   : > { %599 = vmatmul.f32.gmra.mxu2 %v537_v50 }
 0x146   : > { %v500_v51 = vpop.f32.mrf.mxu1 }
 0x147   : > { %v501_v52 = vadd.f32 %v1335_v36, %v500_v51 }
 0x149   : > { %v538_v53 = vmax.f32 %v501_v52, 0.0 }
 0x14b   : > { %602 = vmatmul.f32.gmra.mxu2 %v538_v53 }
 0x14e   : > { %v503_v54 = vpop.f32.mrf.mxu1 }
 0x14f   : > { %v504_v55 = vadd.f32 %v1335_v36, %v503_v54 }
 0x151   : > { %v539_v56 = vmax.f32 %v504_v55, 0.0 }
 0x153   : > { %605 = vmatmul.f32.gmra.mxu2 %v539_v56 }
 0x156   : > { %v506_v57 = vpop.f32.mrf.mxu1 }
 0x157   : > { %v507_v58 = vadd.f32 %v1335_v36, %v506_v57 }
 0x159   : > { %v540_v59 = vmax.f32 %v507_v58, 0.0 }
 0x15b   : > { %608 = vmatmul.f32.gmra.mxu2 %v540_v59 }
 0x15e   : > { %v509_v60 = vpop.f32.mrf.mxu1 }
 0x15f   : > { %v510_v61 = vadd.f32 %v1335_v36, %v509_v60 }
 0x161   : > { %v541_v62 = vmax.f32 %v510_v61, 0.0 }
 0x163   : > { %611 = vmatmul.f32.gmra.mxu2 %v541_v62 }
 0x166   : > { %v512_v63 = vpop.f32.mrf.mxu1 }
 0x167   : > { %v513_v0 = vadd.f32 %v1335_v36, %v512_v63 }
 0x169   : > { %v542_v1 = vmax.f32 %v513_v0, 0.0 }
 0x16b   : > { %614 = vmatmul.f32.gmra.mxu2 %v542_v1 }
 0x16e   : > { %v515_v4 = vpop.f32.mrf.mxu1 }
 0x16f   : > { %v516_v5 = vadd.f32 %v1335_v36, %v515_v4  ;;  %v770_v4 = vld [vmem:[#allocation3 + $0x1f0] sm:$0xff] }
 0x170   : > { %778 = vmatpush.msrb.mxu0 %v770_v4 }
 0x171   : > { %v543_v7 = vmax.f32 %v516_v5, 0.0 }
 0x173   : > { %617 = vmatmul.f32.gmra.mxu2 %v543_v7  ;;  %v769_v7 = vld [vmem:[#allocation3 + $0x1e8] sm:$0xff] }
 0x174   : > { %779 = vmatpush.msrb.mxu0 %v769_v7 }
 0x176   : > { %v518_v11 = vpop.f32.mrf.mxu1  ;;  %780 = vmatpush.msrb.mxu0 %v768_v9 }
 0x177   : > { %v519_v12 = vadd.f32 %v1335_v36, %v518_v11  ;;  %v766_v11 = vld [vmem:[#allocation3 + $0x1d0] sm:$0xff] }
 0x178   : > { %781 = vmatpush.msrb.mxu0 %v767_v10 }
 0x179   : > { %v544_v14 = vmax.f32 %v519_v12, 0.0 }
 0x17a   : > { %782 = vmatpush.msrb.mxu0 %v766_v11 }
 0x17b   : > { %620 = vmatmul.f32.gmra.mxu2 %v544_v14  ;;  %v765_v14 = vld [vmem:[#allocation3 + $0x1c8] sm:$0xff] }
 0x17c   : > { %783 = vmatpush.msrb.mxu0 %v765_v14 }
 0x17e   : > { %v521_v19 = vpop.f32.mrf.mxu1  ;;  %784 = vmatpush.msrb.mxu0 %v764_v16 }
 0x17f   : > { %v522_v20 = vadd.f32 %v1335_v36, %v521_v19  ;;  %v761_v19 = vld [vmem:[#allocation3 + $0x1a8] sm:$0xff] }
 0x180   : > { %785 = vmatpush.msrb.mxu0 %v763_v17 }
 0x181   : > { %v545_v22 = vmax.f32 %v522_v20, 0.0 }
 0x182   : > { %786 = vmatpush.msrb.mxu0 %v762_v18 }
 0x183   : > { %623 = vmatmul.f32.gmra.mxu2 %v545_v22  ;;  %v760_v22 = vld [vmem:[#allocation3 + $0x1a0] sm:$0xff] }
 0x184   : > { %787 = vmatpush.msrb.mxu0 %v761_v19 }
 0x186   : > { %v524_v25 = vpop.f32.mrf.mxu1  ;;  %788 = vmatpush.msrb.mxu0 %v760_v22 }
 0x187   : > { %v525_v26 = vadd.f32 %v1335_v36, %v524_v25  ;;  %v758_v25 = vld [vmem:[#allocation3 + $0x190] sm:$0xff] }
 0x188   : > { %789 = vmatpush.msrb.mxu0 %v759_v24 }
 0x189   : > { %v546_v28 = vmax.f32 %v525_v26, 0.0 }
 0x18a   : > { %790 = vmatpush.msrb.mxu0 %v758_v25 }
 0x18b   : > { %626 = vmatmul.f32.gmra.mxu2 %v546_v28  ;;  %v757_v28 = vld [vmem:[#allocation3 + $0x188] sm:$0xff] }
 0x18c   : > { %791 = vmatpush.msrb.mxu0 %v757_v28 }
 0x18e   : > { %v527_v30 = vpop.f32.mrf.mxu1 }
 0x18f   : > { %v528_v31 = vadd.f32 %v1335_v36, %v527_v30  ;;  %v756_v30 = vld [vmem:[#allocation3 + $0x180] sm:$0xff] }
 0x190   : > { %792 = vmatpush.msrb.mxu0 %v756_v30 }
 0x191   : > { %v547_v32 = vmax.f32 %v528_v31, 0.0 }
 0x193   : > { %629 = vmatmul.f32.gmra.mxu2 %v547_v32 }
 0x196   : > { %v530_v33 = vpop.f32.mrf.mxu1 }
 0x197   : > { %v531_v35 = vadd.f32 %v1335_v36, %v530_v33 }
 0x199   : > { %v548_v37 = vmax.f32 %v531_v35, 0.0 }
 0x19b   : > { %632 = vmatmul.f32.gmra.mxu2 %v548_v37 }
 0x1a6   : > { %v588_v39 = vpop.f32.mrf.mxu2 }
 0x1a7   : > { %v589_v40 = vadd.f32 %v1356_v38, %v588_v39 }
 0x1a9   : > { %v636_v41 = vmax.f32 %v589_v40, 0.0  ;;  %v1059_v40 = vld [vmem:[%s1419_s4 + $0x2] ss:$0 sm:$0xff] }
 0x1ab   : > { %690 = vmatmul.f32.vlgmr.msrb.gmra.mxu3 %v636_v41 }
 0x1ae   : > { %v591_v42 = vpop.f32.mrf.mxu2 }
 0x1af   : > { %v592_v43 = vadd.f32 %v1356_v38, %v591_v42 }
 0x1b1   : > { %v637_v34 = vmax.f32 %v592_v43, 0.0 }
 0x1b3   : > { %693 = vmatmul.f32.gmra.mxu3 %v637_v34 }
 0x1b6   : > { %v594_v44 = vpop.f32.mrf.mxu2 }
 0x1b7   : > { %v595_v36 = vadd.f32 %v1356_v38, %v594_v44 }
 0x1b9   : > { %v638_v45 = vmax.f32 %v595_v36, 0.0 }
 0x1bb   : > { %696 = vmatmul.f32.gmra.mxu3 %v638_v45 }
 0x1be   : > { %v597_v46 = vpop.f32.mrf.mxu2 }
 0x1bf   : > { %v598_v47 = vadd.f32 %v1356_v38, %v597_v46 }
 0x1c1   : > { %v639_v48 = vmax.f32 %v598_v47, 0.0 }
 0x1c3   : > { %699 = vmatmul.f32.gmra.mxu3 %v639_v48 }
 0x1c6   : > { %v600_v49 = vpop.f32.mrf.mxu2 }
 0x1c7   : > { %v601_v50 = vadd.f32 %v1356_v38, %v600_v49 }
 0x1c9   : > { %v640_v51 = vmax.f32 %v601_v50, 0.0 }
 0x1cb   : > { %702 = vmatmul.f32.gmra.mxu3 %v640_v51 }
 0x1ce   : > { %v603_v52 = vpop.f32.mrf.mxu2 }
 0x1cf   : > { %v604_v53 = vadd.f32 %v1356_v38, %v603_v52 }
 0x1d1   : > { %v641_v54 = vmax.f32 %v604_v53, 0.0 }
 0x1d3   : > { %705 = vmatmul.f32.gmra.mxu3 %v641_v54 }
 0x1d6   : > { %v606_v55 = vpop.f32.mrf.mxu2 }
 0x1d7   : > { %v607_v56 = vadd.f32 %v1356_v38, %v606_v55 }
 0x1d9   : > { %v642_v57 = vmax.f32 %v607_v56, 0.0 }
 0x1db   : > { %708 = vmatmul.f32.gmra.mxu3 %v642_v57 }
 0x1de   : > { %v609_v58 = vpop.f32.mrf.mxu2 }
 0x1df   : > { %v610_v59 = vadd.f32 %v1356_v38, %v609_v58 }
 0x1e1   : > { %v643_v60 = vmax.f32 %v610_v59, 0.0 }
 0x1e3   : > { %711 = vmatmul.f32.gmra.mxu3 %v643_v60 }
 0x1e6   : > { %v612_v61 = vpop.f32.mrf.mxu2 }
 0x1e7   : > { %v613_v62 = vadd.f32 %v1356_v38, %v612_v61 }
 0x1e9   : > { %v644_v63 = vmax.f32 %v613_v62, 0.0 }
 0x1eb   : > { %714 = vmatmul.f32.gmra.mxu3 %v644_v63 }
 0x1ee   : > { %v615_v0 = vpop.f32.mrf.mxu2 }
 0x1ef   : > { %v616_v1 = vadd.f32 %v1356_v38, %v615_v0 }
 0x1f1   : > { %v645_v2 = vmax.f32 %v616_v1, 0.0 }
 0x1f3   : > { %717 = vmatmul.f32.gmra.mxu3 %v645_v2 }
 0x1f6   : > { %v618_v5 = vpop.f32.mrf.mxu2 }
 0x1f7   : > { %v619_v6 = vadd.f32 %v1356_v38, %v618_v5 }
 0x1f9   : > { %v646_v8 = vmax.f32 %v619_v6, 0.0 }
 0x1fb   : > { %720 = vmatmul.f32.gmra.mxu3 %v646_v8 }
 0x1fe   : > { %v621_v12 = vpop.f32.mrf.mxu2 }
 0x1ff   : > { %v622_v13 = vadd.f32 %v1356_v38, %v621_v12 }
 0x201   : > { %v647_v15 = vmax.f32 %v622_v13, 0.0 }
 0x203   : > { %723 = vmatmul.f32.gmra.mxu3 %v647_v15 }
 0x206   : > { %v624_v20 = vpop.f32.mrf.mxu2 }
 0x207   : > { %v625_v21 = vadd.f32 %v1356_v38, %v624_v20 }
 0x209   : > { %v648_v23 = vmax.f32 %v625_v21, 0.0 }
 0x20b   : > { %726 = vmatmul.f32.gmra.mxu3 %v648_v23 }
 0x20e   : > { %v627_v26 = vpop.f32.mrf.mxu2 }
 0x20f   : > { %v628_v27 = vadd.f32 %v1356_v38, %v627_v26 }
 0x211   : > { %v649_v29 = vmax.f32 %v628_v27, 0.0 }
 0x213   : > { %729 = vmatmul.f32.gmra.mxu3 %v649_v29 }
 0x216   : > { %v630_v31 = vpop.f32.mrf.mxu2 }
 0x217   : > { %v631_v32 = vadd.f32 %v1356_v38, %v630_v31 }
 0x219   : > { %v650_v33 = vmax.f32 %v631_v32, 0.0 }
 0x21b   : > { %732 = vmatmul.f32.gmra.mxu3 %v650_v33 }
 0x21e   : > { %v633_v35 = vpop.f32.mrf.mxu2 }
 0x21f   : > { %v634_v37 = vadd.f32 %v1356_v38, %v633_v35 }
 0x221   : > { %v651_v39 = vmax.f32 %v634_v37, 0.0 }
 0x223   : > { %735 = vmatmul.f32.gmra.mxu3 %v651_v39 }
 0x22e   : > { %v691_v41 = vpop.f32.mrf.mxu3 }
 0x22f   : > { %v692_v42 = vadd.f32 %v1059_v40, %v691_v41 }
 0x231   : > { %v739_v43 = vmax.f32 %v692_v42, 0.0 }
 0x233   : > { %793 = vmatmul.f32.vlgmr.msrb.gmra.mxu0 %v739_v43 }
 0x236   : > { %v694_v34 = vpop.f32.mrf.mxu3 }
 0x237   : > { %v695_v44 = vadd.f32 %v1059_v40, %v694_v34 }
 0x239   : > { %v740_v36 = vmax.f32 %v695_v44, 0.0 }
 0x23b   : > { %796 = vmatmul.f32.gmra.mxu0 %v740_v36 }
 0x23e   : > { %v697_v45 = vpop.f32.mrf.mxu3 }
 0x23f   : > { %v698_v46 = vadd.f32 %v1059_v40, %v697_v45 }
 0x241   : > { %v741_v47 = vmax.f32 %v698_v46, 0.0 }
 0x243   : > { %799 = vmatmul.f32.gmra.mxu0 %v741_v47 }
 0x246   : > { %v700_v48 = vpop.f32.mrf.mxu3 }
 0x247   : > { %v701_v38 = vadd.f32 %v1059_v40, %v700_v48 }
 0x249   : > { %v742_v49 = vmax.f32 %v701_v38, 0.0 }
 0x24b   : > { %802 = vmatmul.f32.gmra.mxu0 %v742_v49 }
 0x24e   : > { %v703_v50 = vpop.f32.mrf.mxu3 }
 0x24f   : > { %v704_v51 = vadd.f32 %v1059_v40, %v703_v50 }
 0x251   : > { %v743_v52 = vmax.f32 %v704_v51, 0.0 }
 0x253   : > { %805 = vmatmul.f32.gmra.mxu0 %v743_v52 }
 0x256   : > { %v706_v53 = vpop.f32.mrf.mxu3 }
 0x257   : > { %v707_v54 = vadd.f32 %v1059_v40, %v706_v53 }
 0x259   : > { %v744_v55 = vmax.f32 %v707_v54, 0.0 }
 0x25b   : > { %808 = vmatmul.f32.gmra.mxu0 %v744_v55 }
 0x25e   : > { %v709_v56 = vpop.f32.mrf.mxu3 }
 0x25f   : > { %v710_v57 = vadd.f32 %v1059_v40, %v709_v56 }
 0x261   : > { %v745_v58 = vmax.f32 %v710_v57, 0.0 }
 0x263   : > { %811 = vmatmul.f32.gmra.mxu0 %v745_v58 }
 0x266   : > { %v712_v59 = vpop.f32.mrf.mxu3 }
 0x267   : > { %v713_v60 = vadd.f32 %v1059_v40, %v712_v59 }
 0x269   : > { %v746_v61 = vmax.f32 %v713_v60, 0.0 }
 0x26b   : > { %814 = vmatmul.f32.gmra.mxu0 %v746_v61 }
 0x26e   : > { %v715_v62 = vpop.f32.mrf.mxu3 }
 0x26f   : > { %v716_v63 = vadd.f32 %v1059_v40, %v715_v62 }
 0x271   : > { %v747_v0 = vmax.f32 %v716_v63, 0.0 }
 0x273   : > { %817 = vmatmul.f32.gmra.mxu0 %v747_v0 }
 0x276   : > { %v718_v1 = vpop.f32.mrf.mxu3 }
 0x277   : > { %v719_v2 = vadd.f32 %v1059_v40, %v718_v1 }
 0x279   : > { %v748_v3 = vmax.f32 %v719_v2, 0.0 }
 0x27b   : > { %820 = vmatmul.f32.gmra.mxu0 %v748_v3 }
 0x27e   : > { %v721_v4 = vpop.f32.mrf.mxu3 }
 0x27f   : > { %v722_v5 = vadd.f32 %v1059_v40, %v721_v4 }
 0x281   : > { %v749_v6 = vmax.f32 %v722_v5, 0.0 }
 0x283   : > { %823 = vmatmul.f32.gmra.mxu0 %v749_v6 }
 0x286   : > { %v724_v7 = vpop.f32.mrf.mxu3 }
 0x287   : > { %v725_v8 = vadd.f32 %v1059_v40, %v724_v7  ;;  %v858_v7 = vld [vmem:[%s1420_s5] sm:$0x1] }
 0x289   : > { %v750_v9 = vmax.f32 %v725_v8, 0.0  ;;  %v860_v8 = vstv %s859_s9 }
 0x28b   : > { %826 = vmatmul.f32.gmra.mxu0 %v750_v9 }
 0x28e   : > { %v727_v10 = vpop.f32.mrf.mxu3 }
 0x28f   : > { %v728_v11 = vadd.f32 %v1059_v40, %v727_v10 }
 0x291   : > { %v751_v12 = vmax.f32 %v728_v11, 0.0 }
 0x293   : > { %829 = vmatmul.f32.gmra.mxu0 %v751_v12 }
 0x296   : > { %v730_v13 = vpop.f32.mrf.mxu3 }
 0x297   : > { %v731_v14 = vadd.f32 %v1059_v40, %v730_v13 }
 0x299   : > { %v752_v15 = vmax.f32 %v731_v14, 0.0 }
 0x29b   : > { %832 = vmatmul.f32.gmra.mxu0 %v752_v15 }
 0x29e   : > { %v733_v16 = vpop.f32.mrf.mxu3 }
 0x29f   : > { %v734_v17 = vadd.f32 %v1059_v40, %v733_v16 }
 0x2a1   : > { %v753_v18 = vmax.f32 %v734_v17, 0.0 }
 0x2a3   : > { %835 = vmatmul.f32.gmra.mxu0 %v753_v18 }
 0x2a6   : > { %v736_v19 = vpop.f32.mrf.mxu3 }
 0x2a7   : > { %v737_v20 = vadd.f32 %v1059_v40, %v736_v19  ;;  %v1060_v40 = vld [vmem:[%s1419_s4 + $0x3] ss:$0 sm:$0xff] }
 0x2a9   : > { %v754_v21 = vmax.f32 %v737_v20, 0.0 }
 0x2ab   : > { %838 = vmatmul.f32.gmra.mxu0 %v754_v21 }
 0x2b0   : > { %v794_v22 = vpop.f32.mrf.mxu0 }
 0x2b1   : > { %v795_v4 = vadd.f32 %v1060_v40, %v794_v22 }
 0x2b3   : > { %v842_v6 = vmax.f32 %v795_v4, 0.0 }
 0x2b8   : > { %v797_v23 = vpop.f32.mrf.mxu0 }
 0x2b9   : > { %v798_v2 = vadd.f32 %v1060_v40, %v797_v23 }
 0x2bb   : > { %v843_v5 = vmax.f32 %v798_v2, 0.0 }
 0x2c0   : > { %v800_v24 = vpop.f32.mrf.mxu0 }
 0x2c1   : > { %v801_v0 = vadd.f32 %v1060_v40, %v800_v24 }
 0x2c3   : > { %v844_v3 = vmax.f32 %v801_v0, 0.0 }
 0x2c8   : > { %v803_v25 = vpop.f32.mrf.mxu0 }
 0x2c9   : > { %v804_v62 = vadd.f32 %v1060_v40, %v803_v25 }
 0x2cb   : > { %v845_v1 = vmax.f32 %v804_v62, 0.0 }
 0x2d0   : > { %v806_v26 = vpop.f32.mrf.mxu0 }
 0x2d1   : > { %v807_v60 = vadd.f32 %v1060_v40, %v806_v26 }
 0x2d3   : > { %v846_v63 = vmax.f32 %v807_v60, 0.0 }
 0x2d8   : > { %v809_v27 = vpop.f32.mrf.mxu0 }
 0x2d9   : > { %v810_v58 = vadd.f32 %v1060_v40, %v809_v27 }
 0x2db   : > { %v847_v61 = vmax.f32 %v810_v58, 0.0 }
 0x2e0   : > { %v812_v28 = vpop.f32.mrf.mxu0 }
 0x2e1   : > { %v813_v56 = vadd.f32 %v1060_v40, %v812_v28 }
 0x2e3   : > { %v848_v59 = vmax.f32 %v813_v56, 0.0 }
 0x2e8   : > { %v815_v29 = vpop.f32.mrf.mxu0 }
 0x2e9   : > { %v816_v54 = vadd.f32 %v1060_v40, %v815_v29 }
 0x2eb   : > { %v849_v57 = vmax.f32 %v816_v54, 0.0 }
 0x2f0   : > { %v818_v30 = vpop.f32.mrf.mxu0 }
 0x2f1   : > { %v819_v52 = vadd.f32 %v1060_v40, %v818_v30 }
 0x2f3   : > { %v850_v55 = vmax.f32 %v819_v52, 0.0 }
 0x2f8   : > { %v821_v31 = vpop.f32.mrf.mxu0 }
 0x2f9   : > { %v822_v50 = vadd.f32 %v1060_v40, %v821_v31 }
 0x2fb   : > { %v851_v53 = vmax.f32 %v822_v50, 0.0 }
 0x300   : > { %v824_v32 = vpop.f32.mrf.mxu0 }
 0x301   : > { %v825_v38 = vadd.f32 %v1060_v40, %v824_v32 }
 0x303   : > { %v852_v51 = vmax.f32 %v825_v38, 0.0 }
 0x308   : > { %v827_v33 = vpop.f32.mrf.mxu0 }
 0x309   : > { %v828_v47 = vadd.f32 %v1060_v40, %v827_v33 }
 0x30b   : > { %v853_v49 = vmax.f32 %v828_v47, 0.0 }
 0x310   : > { %v830_v35 = vpop.f32.mrf.mxu0 }
 0x311   : > { %v831_v45 = vadd.f32 %v1060_v40, %v830_v35 }
 0x313   : > { %v854_v48 = vmax.f32 %v831_v45, 0.0 }
 0x318   : > { %v833_v37 = vpop.f32.mrf.mxu0 }
 0x319   : > { %v834_v44 = vadd.f32 %v1060_v40, %v833_v37 }
 0x31b   : > { %v855_v46 = vmax.f32 %v834_v44, 0.0 }
 0x320   : > { %v836_v39 = vpop.f32.mrf.mxu0 }
 0x321   : > { %v837_v43 = vadd.f32 %v1060_v40, %v836_v39 }
 0x323   : > { %v856_v36 = vmax.f32 %v837_v43, 0.0 }
 0x328   : > { %v839_v41 = vpop.f32.mrf.mxu0 }
 0x329   : > { %v840_v42 = vadd.f32 %v1060_v40, %v839_v41 }
 0x32b   : > { %v857_v34 = vmax.f32 %v840_v42, 0.0 }
 0x32d   : > { %861 = vmatpush.xpose.msrb.mxu1 %v857_v34 }
 0x331   : > { %862 = vmatpush.xpose.msrb.mxu1 %v856_v36 }
 0x335   : > { %863 = vmatpush.xpose.msrb.mxu1 %v855_v46 }
 0x339   : > { %864 = vmatpush.xpose.msrb.mxu1 %v854_v48 }
 0x33d   : > { %865 = vmatpush.xpose.msrb.mxu1 %v853_v49 }
 0x341   : > { %866 = vmatpush.xpose.msrb.mxu1 %v852_v51 }
 0x345   : > { %867 = vmatpush.xpose.msrb.mxu1 %v851_v53 }
 0x349   : > { %868 = vmatpush.xpose.msrb.mxu1 %v850_v55 }
 0x34d   : > { %869 = vmatpush.xpose.msrb.mxu1 %v849_v57 }
 0x351   : > { %870 = vmatpush.xpose.msrb.mxu1 %v848_v59 }
 0x355   : > { %871 = vmatpush.xpose.msrb.mxu1 %v847_v61 }
 0x359   : > { %872 = vmatpush.xpose.msrb.mxu1 %v846_v63 }
 0x35d   : > { %873 = vmatpush.xpose.msrb.mxu1 %v845_v1 }
 0x361   : > { %874 = vmatpush.xpose.msrb.mxu1 %v844_v3 }
 0x365   : > { %875 = vmatpush.xpose.msrb.mxu1 %v843_v5 }
 0x369   : > { %876 = vmatpush.xpose.msrb.mxu1 %v842_v6 }
 0x36c   : > { %877 = vmatmul.f32.vlgmr.msrb.gmra.mxu1 %v858_v7 }
 0x3e9   : > { %v878_v9 = vpop.f32.mrf.mxu1 }
 0x3ea   : > { %v879_v10 = vadd.f32 %v878_v9, %v860_v8 }
 0x3ec   : > { %v881_v11 = vand.u32 2147483647, %v879_v10  ;;  %vm887_vm1 = vcmp.ge.f32.partialorder %v879_v10, 0.0 }
 0x3ee   : > { %v882_v12 = vsub.f32 0.0, %v881_v11 }
 0x3f0   : > { %v883_v13 = vmul.f32 1.442695, %v882_v12 }
 0x3f2   : > { %1061 = vpow2.f32 %v883_v13 }
 0x3f8   : > { %v1062_v14 = vpop.eup %1061 }
 0x3f9   : > { %v885_v15 = vadd.f32 1.0, %v1062_v14 }
 0x3fb   : > { %1063 = vrcp.f32 %v885_v15 }
 0x401   : > { %v1064_v16 = vpop.eup %1063 }
 0x402   : > { %v888_v17 = vmul.f32 %v1064_v16, %v1062_v14 }
 0x404   : > { %v889_v18 = vsel %vm887_vm1, %v1064_v16, %v888_v17 }
 0x405   : > { %890 = vst [vmem:[%s289_s17] sm:$0x1] %v889_v18 }
 0x406   : > { %1122 = shalt.err (!%p1119_p8)
}
 0x407   : > { %1008 = dma.vmem_to_hbm [thread:$0]  (%p1247_p5), %s903_s18, 16, %s905_s19, %s892_s20  }
 0x408 PF: > { %p1020_p9 = scmp.ge.s32.totalorder %s1161_s29, 2  ;;  %s916_s9 = sand.u32 1, %s1149_s26  }
 0x409   : > { %s917_s10 = scalar_lea.sflag [#allocation5], %s916_s9 }
 0x40a   : > { %p1015_p10 = pnand %p1020_p9, %p1251_p6 }
 0x40c   : > { %p1016_p11 = pneg %p1015_p10 }
 0x40e   : > { %1144 = dma.done.wait (%p1016_p11), %s917_s10, 16  }
 0x40f   : > { %1146 = vsyncadd (%p1016_p11), %s917_s10, 4294967280  ;;  %p19_p12 = scmp.ge.s32.totalorder %s1234_s8, 4   ;;  %s1425_s26 = smov %s1153_s27 }
 0x410   : > { %s1426_s27 = smov %s1157_s28  ;;  %s1427_s28 = smov %s1245_s11 }
 0x411   : > { %s1428_s29 = smov %s1234_s8  ;;  %21 = sbr.rel (!%p19_p12) target bundleno = 6 (0x6), region = 94 }
 0x416   :  { %922 = vsyncpa [#allocation4], 1 }
 0x417   :  { %924 = vsyncpa [#allocation4 + $0x1], 1 }
 0x418   :  { %925 = vsyncpa [#allocation5], 1 }
 0x419   :  { %927 = vsyncpa [#allocation5 + $0x1], 1 }

</bundles_post_ra>
